<compile_context>
chip_gen: v5e
topology: v5e:2x2
jax: 0.10.0
libtpu: 0.0.40
codegen_flags: <defaults>
</compile_context>

<pallas_src>
import jax
import jax.numpy as jnp
from jax import lax
from jax.experimental import pallas as pl
from jax.experimental.pallas import tpu as pltpu

K = 7        # conv kernel size
PAD = 3      # conv padding


def _vmem_capacity_bytes():
    """Per-core VMEM capacity; conservative fallback if the query is unavailable."""
    try:
        return int(pltpu.get_tpu_info().vmem_capacity_bytes)
    except Exception:
        return 64 << 20      # conservative (v7x per-TensorCore)


_VMEM_CAP = _vmem_capacity_bytes()
_BIG_VMEM = _VMEM_CAP >= (100 << 20)          # v5e/v6e: 128 MiB; v7x: 64 MiB per TC
_BLOCK_BUDGET = (8 << 20) if _BIG_VMEM else (4 << 20)
_VMEM_LIMIT = max(min(_VMEM_CAP * 3 // 4, 96 << 20), 32 << 20)
# v7x shards the "parallel" grid axis across two TensorCores: prefer an even
# number of grid steps there so neither core idles for a whole step.
_PREFER_EVEN_STEPS = not _BIG_VMEM


def _pick_batch_tile(n, per_elem_bytes, budget=_BLOCK_BUDGET,
                     prefer_even_steps=_PREFER_EVEN_STEPS):
    """Largest divisor of n whose block fits the byte budget; on two-TC parts
    prefer a tile that leaves an even number of grid steps."""
    divisors = [d for d in range(1, n + 1) if n % d == 0]
    fits = [d for d in divisors if d * per_elem_bytes <= budget] or [1]
    if prefer_even_steps:
        even = [d for d in fits if (n // d) % 2 == 0]
        if even:
            return max(even)
    return max(fits)


def _spatial_attention_kernel(b_ref, ma_ref, mm_ref, x_ref, o_ref):
    """One grid step = TB batch elements, fully vectorized (no per-b loop).

    b_ref  : SMEM (1,)         folded conv+BN bias
    ma_ref : VMEM (HW, HW)     dense conv matrix applied to the channel-mean map
    mm_ref : VMEM (HW, HW)     dense conv matrix applied to the channel-max map
    x_ref  : VMEM (TB, C, HW)  lane-dense input block
    o_ref  : VMEM (TB, C, HW)  lane-dense output block
    """
    xb = x_ref[...]                                      # (TB, C, HW) native dtype
    xf = xb.astype(jnp.float32)

    # Channel reductions (mean / max over dim=1 of NCHW), batched over TB.
    avg = jnp.mean(xf, axis=1)                           # (TB, HW)
    mx = jnp.max(xf, axis=1)                             # (TB, HW)

    # 7x7 conv + folded BN as two small MXU matmuls (conv-as-matrix).
    pre = (jnp.dot(avg, ma_ref[...], preferred_element_type=jnp.float32)
           + jnp.dot(mx, mm_ref[...], preferred_element_type=jnp.float32)
           + b_ref[0])                                   # (TB, HW)

    # Sigmoid gate, cast once to the output dtype (keeps bf16 multiply in bf16),
    # then a single batched broadcast-multiply store.
    attn = jax.nn.sigmoid(pre).astype(o_ref.dtype)       # (TB, HW)
    o_ref[...] = xb * attn[:, None, :]


def _conv_matrices(w_folded, H, W):
    """Dense (H*W, H*W) matrices M_c such that
         flat(conv2d(img, w_c, pad=3)) == flat(img) @ M_c
    built by convolving one-hot basis images (correct by construction,
    including the zero padding)."""
    HW = H * W
    basis = jnp.eye(HW, dtype=jnp.float32).reshape(HW, 1, H, W)

    def one(wc):  # wc: (K, K)
        out = lax.conv_general_dilated(
            basis, wc.reshape(1, 1, K, K).astype(jnp.float32),
            window_strides=(1, 1), padding=[(PAD, PAD), (PAD, PAD)],
            dimension_numbers=("NCHW", "OIHW", "NCHW"))
        return out.reshape(HW, HW)

    return one(w_folded[0, 0]), one(w_folded[0, 1])


@jax.jit
def spatial_attention(x, conv_w, conv_b, bn_gamma, bn_beta, bn_mean, bn_var,
                      eps=1e-5):
    """x: (N, C, H, W).  conv_w: (1, 2, 7, 7).  conv_b: (1,).  BN params: (1,)."""
    N, C, H, W = x.shape
    HW = H * W

    # Fold inference-mode BatchNorm into the conv weights / bias (plain-JAX glue).
    # TODO(synk): training-mode BatchNorm (batch statistics + running-stat update)
    # is not reproduced; this kernel implements eval-mode BN folded into the conv.
    scale = bn_gamma / jnp.sqrt(bn_var + eps)                                    # (1,)
    w_folded = (conv_w * scale.reshape(1, 1, 1, 1)).astype(jnp.float32)          # (1,2,7,7)
    b_folded = (scale * conv_b + bn_beta - scale * bn_mean).astype(jnp.float32)  # (1,)

    # Dense conv-as-matmul weights for the MXU path (tiny at CBAM map sizes).
    m_avg, m_max = _conv_matrices(w_folded, H, W)                                # (HW, HW) x2

    # Lane-dense view of x (free: NCHW is contiguous as (N, C, H*W)).
    x_flat = x.reshape(N, C, HW)

    TB = _pick_batch_tile(N, C * HW * x.dtype.itemsize)

    grid_spec = pltpu.PrefetchScalarGridSpec(
        num_scalar_prefetch=0,
        grid=(N // TB,),
        in_specs=[
            pl.BlockSpec(memory_space=pltpu.MemorySpace.SMEM),   # folded bias (1,)
            pl.BlockSpec((HW, HW), lambda n: (0, 0)),            # M_avg (constant index -> fetched once)
            pl.BlockSpec((HW, HW), lambda n: (0, 0)),            # M_max (constant index -> fetched once)
            pl.BlockSpec((TB, C, HW), lambda n: (n, 0, 0)),      # x block (lane-dense)
        ],
        out_specs=pl.BlockSpec((TB, C, HW), lambda n: (n, 0, 0)),
    )

    out_flat = pl.pallas_call(
        _spatial_attention_kernel,
        out_shape=jax.ShapeDtypeStruct((N, C, HW), x.dtype),
        grid_spec=grid_spec,
        compiler_params=pltpu.CompilerParams(
            dimension_semantics=("parallel",),
            vmem_limit_bytes=_VMEM_LIMIT,
        ),
    )(b_folded, m_avg, m_max, x_flat)

    return out_flat.reshape(N, C, H, W)


def _reference(x, conv_w, conv_b, bn_gamma, bn_beta, bn_mean, bn_var, eps=1e-5):
    """Pure-JAX reference matching the PyTorch forward (eval-mode BN)."""
    avg = jnp.mean(x, axis=1, keepdims=True)
    mx = jnp.max(x, axis=1, keepdims=True)
    cat = jnp.concatenate([avg, mx], axis=1)                       # (N, 2, H, W)
    y = lax.conv_general_dilated(
        cat, conv_w, window_strides=(1, 1), padding=[(PAD, PAD), (PAD, PAD)],
        dimension_numbers=("NCHW", "OIHW", "NCHW")) + conv_b.reshape(1, 1, 1, 1)
    y = (y - bn_mean.reshape(1, 1, 1, 1)) / jnp.sqrt(bn_var.reshape(1, 1, 1, 1) + eps)
    y = y * bn_gamma.reshape(1, 1, 1, 1) + bn_beta.reshape(1, 1, 1, 1)
    return x * jax.nn.sigmoid(y)


if __name__ == "__main__":
    key = jax.random.PRNGKey(0)
    kx, kw, kb = jax.random.split(key, 3)

    N, C, H, W = 2, 4, 16, 16
    x = jax.random.normal(kx, (N, C, H, W), dtype=jnp.float32)

    # Deterministic synthetic params (Conv2d(2, 1, 7, padding=3) + BatchNorm2d(1)).
    fan_in = 2 * K * K
    bound = 1.0 / (fan_in ** 0.5)
    conv_w = jax.random.uniform(kw, (1, 2, K, K), jnp.float32, -bound, bound)
    conv_b = jax.random.uniform(kb, (1,), jnp.float32, -bound, bound)
    bn_gamma = jnp.ones((1,), jnp.float32)
    bn_beta = jnp.zeros((1,), jnp.float32)
    bn_mean = jnp.zeros((1,), jnp.float32)   # running_mean (inference-mode BN)
    bn_var = jnp.ones((1,), jnp.float32)     # running_var  (inference-mode BN)

    out = spatial_attention(x, conv_w, conv_b, bn_gamma, bn_beta, bn_mean, bn_var)
    out = jax.block_until_ready(out)

    ref = _reference(x, conv_w, conv_b, bn_gamma, bn_beta, bn_mean, bn_var)
    assert out.shape == x.shape and out.dtype == x.dtype
    assert jnp.allclose(out, ref, atol=1e-5, rtol=1e-5), float(jnp.max(jnp.abs(out - ref)))

    print("KERNEL_OK")
</pallas_src>

<mosaic_0001>
module attributes {stable_mosaic.version = 11 : i64} {
  func.func @_spatial_attention_kernel(%arg0: i32, %arg1: memref<1xf32, #tpu.memory_space<smem>>, %arg2: memref<256x256xf32, #tpu.memory_space<vmem>>, %arg3: memref<256x256xf32, #tpu.memory_space<vmem>>, %arg4: memref<1x4x256xf32, #tpu.memory_space<vmem>>, %arg5: memref<1x4x256xf32, #tpu.memory_space<vmem>>) attributes {dimension_semantics = [#tpu.dimension_semantics<parallel>], iteration_bounds = array<i64: 2>, scalar_prefetch = 0 : i64, scratch_operands = 0 : i64, tpu.core_type = #tpu.core_type<tc>, window_params = [{transform_indices = @transform_0, window_bounds = array<i64: 1>}, {pipeline_mode = #tpu.pipeline_mode<synchronous>, transform_indices = @transform_1, window_bounds = array<i64: 256, 256>}, {pipeline_mode = #tpu.pipeline_mode<synchronous>, transform_indices = @transform_2, window_bounds = array<i64: 256, 256>}, {transform_indices = @transform_3, window_bounds = array<i64: 1, 4, 256>}, {transform_indices = @transform_4, window_bounds = array<i64: 1, 4, 256>}]} {
    %c0 = arith.constant 0 : index
    %c0_0 = arith.constant 0 : index
    %c0_1 = arith.constant 0 : index
    %0 = vector.load %arg4[%c0, %c0_0, %c0_1] : memref<1x4x256xf32, #tpu.memory_space<vmem>>, vector<1x4x256xf32>
    %cst = arith.constant dense<0.000000e+00> : vector<1x256xf32>
    %1 = vector.multi_reduction <add>, %0, %cst [1] : vector<1x4x256xf32> to vector<1x256xf32>
    %cst_2 = arith.constant 4.000000e+00 : f32
    %2 = vector.broadcast %cst_2 : f32 to vector<1x256xf32>
    %3 = arith.divf %1, %2 : vector<1x256xf32>
    %cst_3 = arith.constant dense<0xFF800000> : vector<1x256xf32>
    %4 = vector.multi_reduction <maximumf>, %0, %cst_3 [1] : vector<1x4x256xf32> to vector<1x256xf32>
    %c0_4 = arith.constant 0 : index
    %c0_5 = arith.constant 0 : index
    %5 = vector.load %arg2[%c0_4, %c0_5] : memref<256x256xf32, #tpu.memory_space<vmem>>, vector<256x256xf32>
    %cst_6 = arith.constant dense<0.000000e+00> : vector<1x256xf32>
    %6 = tpu.matmul %3, %5, %cst_6 {dimension_numbers = #tpu.dot_dimension_numbers<[1], [0], [0], [1], [0, 0, 1, 1], [], []>} : vector<1x256xf32>, vector<256x256xf32>, vector<1x256xf32> -> vector<1x256xf32>
    %c0_7 = arith.constant 0 : index
    %c0_8 = arith.constant 0 : index
    %7 = vector.load %arg3[%c0_7, %c0_8] : memref<256x256xf32, #tpu.memory_space<vmem>>, vector<256x256xf32>
    %cst_9 = arith.constant dense<0.000000e+00> : vector<1x256xf32>
    %8 = tpu.matmul %4, %7, %cst_9 {dimension_numbers = #tpu.dot_dimension_numbers<[1], [0], [0], [1], [0, 0, 1, 1], [], []>} : vector<1x256xf32>, vector<256x256xf32>, vector<1x256xf32> -> vector<1x256xf32>
    %9 = arith.addf %6, %8 : vector<1x256xf32>
    %c0_10 = arith.constant 0 : index
    %10 = memref.load %arg1[%c0_10] : memref<1xf32, #tpu.memory_space<smem>>
    %11 = vector.broadcast %10 : f32 to vector<1x256xf32>
    %12 = arith.addf %9, %11 : vector<1x256xf32>
    %13 = arith.negf %12 : vector<1x256xf32>
    %14 = math.exp %13 : vector<1x256xf32>
    %cst_11 = arith.constant 1.000000e+00 : f32
    %15 = vector.broadcast %cst_11 : f32 to vector<1x256xf32>
    %16 = arith.addf %15, %14 : vector<1x256xf32>
    %17 = arith.divf %15, %16 : vector<1x256xf32>
    %18 = vector.shape_cast %17 : vector<1x256xf32> to vector<1x1x256xf32>
    %19 = vector.broadcast %18 : vector<1x1x256xf32> to vector<1x4x256xf32>
    %20 = arith.mulf %0, %19 : vector<1x4x256xf32>
    %c0_12 = arith.constant 0 : index
    %c0_13 = arith.constant 0 : index
    %c0_14 = arith.constant 0 : index
    %21 = vector.load %arg5[%c0_12, %c0_13, %c0_14] : memref<1x4x256xf32, #tpu.memory_space<vmem>>, vector<1x4x256xf32>
    tpu.vector_store %arg5[%c0_12, %c0_13, %c0_14], %20 {strides = array<i32>} : memref<1x4x256xf32, #tpu.memory_space<vmem>>, vector<1x4x256xf32>,
    return
  }
  func.func @transform_0(%arg0: i32) -> i32 {
    %c0_i32 = arith.constant 0 : i32
    %c0_i32_0 = arith.constant 0 : i32
    return %c0_i32 : i32
  }
  func.func @transform_1(%arg0: i32) -> (i32, i32) {
    %c0_i32 = arith.constant 0 : i32
    %c0_i32_0 = arith.constant 0 : i32
    %c0_i32_1 = arith.constant 0 : i32
    return %c0_i32, %c0_i32_0 : i32, i32
  }
  func.func @transform_2(%arg0: i32) -> (i32, i32) {
    %c0_i32 = arith.constant 0 : i32
    %c0_i32_0 = arith.constant 0 : i32
    %c0_i32_1 = arith.constant 0 : i32
    return %c0_i32, %c0_i32_0 : i32, i32
  }
  func.func @transform_3(%arg0: i32) -> (i32, i32, i32) {
    %c0_i32 = arith.constant 0 : i32
    %c0_i32_0 = arith.constant 0 : i32
    %c0_i32_1 = arith.constant 0 : i32
    return %arg0, %c0_i32, %c0_i32_0 : i32, i32, i32
  }
  func.func @transform_4(%arg0: i32) -> (i32, i32, i32) {
    %c0_i32 = arith.constant 0 : i32
    %c0_i32_0 = arith.constant 0 : i32
    %c0_i32_1 = arith.constant 0 : i32
    return %arg0, %c0_i32, %c0_i32_0 : i32, i32, i32
  }
}

</mosaic_0001>

<bundles_post_ra>
// kernel: spatial_attention.1
= control target key start
LH: loop header
LB: loop body
LE: loop exit
PB: predicated region body
PF: predicated region fallthrough
CT: control target
= control target key end

     0   :  { %s714_s17 = smov 0   ;;  %s1149_s0 = inlined_call_operand.<no memory space> [shape: f32[1], index: 0, kind: input, shape index: {}]   ;;  %s1150_s1 = inlined_call_operand.vmem [shape: f32[256,256], index: 1, kind: input, shape index: {}]   ;;  %s1151_s2 = inlined_call_operand.vmem [shape: f32[256,256], index: 2, kind: input, shape index: {}]   ;;  %s1152_s3 = inlined_call_operand.vmem [shape: f32[2,4,256], index: 3, kind: input, shape index: {}]   ;;  %s1153_s4 = inlined_call_operand.vmem [shape: f32[2,4,256], index: 4, kind: output, shape index: {}]  }
   0x1   :  { %9 = sst [smem:[#allocation2]] %s1149_s0 }
   0x2 LB: > { %s643_s18 = sadd.s32 4294967295, %s683_s17   ;;  %p647_p0 = scmp.ge.s32.totalorder %s683_s17, 1  ;;  %s683_s17 = sphi %s714_s17, %s15_s17  }
   0x3   : > { %p163_p1 = scmp.lt.s32.totalorder %s683_s17, 3 }
   0x5   : > { %p164_p2 = pnand %p647_p0, %p163_p1 }
   0x6   : > { %p874_p3 = scmp.lt.s32.totalorder (!%p164_p2), %s643_s18, 1  ;;  %s537_s8 = sld [smem:[#allocation2]] (!%p164_p2) }
   0x7   : > { %167 = sbr.rel (%p164_p2) target bundleno = 259 (0x103), region = 36 }
   0xc   : > { %v343_v0 = vld [vmem:[%s1151_s2 + $0xf0] sm:$0xff]  ;;  %v344_v1 = vld [vmem:[%s1151_s2 + $0xf8] sm:$0xff]  ;;  %v341_v2 = vld [vmem:[%s1151_s2 + $0xe0] sm:$0xff]  ;;  %s1156_s18 = smov (!%p874_p3, %s643_s18), 1  ;;  %vm206_vm0 = vcmask 1043456  }
   0xd   : > { %377 = vmatpush.msra.mxu0 %v343_v0  ;;  %417 = vmatpush.msra.mxu2 %v344_v1  ;;  %v375_v3 = vld [vmem:[%s1151_s2 + $0x1f0] sm:$0xff]  ;;  %v342_v4 = vld [vmem:[%s1151_s2 + $0xe8] sm:$0xff]  ;;  %v376_v5 = vld [vmem:[%s1151_s2 + $0x1f8] sm:$0xff]  ;;  %s656_s26 = sshll.u32 %s1156_s18, 3 }
   0xe   : > { %397 = vmatpush.msra.mxu1 %v375_v3  ;;  %437 = vmatpush.msra.mxu3 %v376_v5  ;;  %v339_v6 = vld [vmem:[%s1151_s2 + $0xd0] sm:$0xff]  ;;  %v373_v7 = vld [vmem:[%s1151_s2 + $0x1e0] sm:$0xff]  ;;  %v340_v8 = vld [vmem:[%s1151_s2 + $0xd8] sm:$0xff]  ;;  %s193_s15 = scalar_lea.vmem %s1152_s3, %s656_s26  ;;  %s198_s11 = scalar_lea.vmem %s1153_s4, %s656_s26 }
   0xf   : > { %378 = vmatpush.msra.mxu0 %v341_v2  ;;  %418 = vmatpush.msra.mxu2 %v342_v4  ;;  %v374_v9 = vld [vmem:[%s1151_s2 + $0x1e8] sm:$0xff]  ;;  %v371_v10 = vld [vmem:[%s1151_s2 + $0x1d0] sm:$0xff]  ;;  %v337_v11 = vld [vmem:[%s1151_s2 + $0xc0] sm:$0xff] }
  0x10   : > { %398 = vmatpush.msra.mxu1 %v373_v7  ;;  %438 = vmatpush.msra.mxu3 %v374_v9  ;;  %v338_v12 = vld [vmem:[%s1151_s2 + $0xc8] sm:$0xff]  ;;  %v372_v13 = vld [vmem:[%s1151_s2 + $0x1d8] sm:$0xff]  ;;  %v369_v14 = vld [vmem:[%s1151_s2 + $0x1c0] sm:$0xff] }
  0x11   : > { %379 = vmatpush.msra.mxu0 %v339_v6  ;;  %419 = vmatpush.msra.mxu2 %v340_v8  ;;  %v370_v15 = vld [vmem:[%s1151_s2 + $0x1c8] sm:$0xff]  ;;  %v335_v16 = vld [vmem:[%s1151_s2 + $0xb0] sm:$0xff]  ;;  %v336_v17 = vld [vmem:[%s1151_s2 + $0xb8] sm:$0xff] }
  0x12   : > { %399 = vmatpush.msra.mxu1 %v371_v10  ;;  %439 = vmatpush.msra.mxu3 %v372_v13  ;;  %v367_v18 = vld [vmem:[%s1151_s2 + $0x1b0] sm:$0xff]  ;;  %v368_v19 = vld [vmem:[%s1151_s2 + $0x1b8] sm:$0xff]  ;;  %v333_v20 = vld [vmem:[%s1151_s2 + $0xa0] sm:$0xff] }
  0x13   : > { %380 = vmatpush.msra.mxu0 %v337_v11  ;;  %420 = vmatpush.msra.mxu2 %v338_v12  ;;  %v334_v21 = vld [vmem:[%s1151_s2 + $0xa8] sm:$0xff]  ;;  %v365_v22 = vld [vmem:[%s1151_s2 + $0x1a0] sm:$0xff]  ;;  %v331_v24 = vld [vmem:[%s1151_s2 + $0x90] sm:$0xff] }
  0x14   : > { %400 = vmatpush.msra.mxu1 %v369_v14  ;;  %440 = vmatpush.msra.mxu3 %v370_v15  ;;  %v366_v23 = vld [vmem:[%s1151_s2 + $0x1a8] sm:$0xff]  ;;  %v332_v25 = vld [vmem:[%s1151_s2 + $0x98] sm:$0xff]  ;;  %v363_v26 = vld [vmem:[%s1151_s2 + $0x190] sm:$0xff] }
  0x15   : > { %381 = vmatpush.msra.mxu0 %v335_v16  ;;  %421 = vmatpush.msra.mxu2 %v336_v17  ;;  %v364_v27 = vld [vmem:[%s1151_s2 + $0x198] sm:$0xff]  ;;  %v329_v28 = vld [vmem:[%s1151_s2 + $0x80] sm:$0xff]  ;;  %v330_v29 = vld [vmem:[%s1151_s2 + $0x88] sm:$0xff] }
  0x16   : > { %401 = vmatpush.msra.mxu1 %v367_v18  ;;  %441 = vmatpush.msra.mxu3 %v368_v19  ;;  %v361_v30 = vld [vmem:[%s1151_s2 + $0x180] sm:$0xff]  ;;  %v362_v31 = vld [vmem:[%s1151_s2 + $0x188] sm:$0xff]  ;;  %v327_v32 = vld [vmem:[%s1151_s2 + $0x70] sm:$0xff] }
  0x17   : > { %382 = vmatpush.msra.mxu0 %v333_v20  ;;  %422 = vmatpush.msra.mxu2 %v334_v21  ;;  %v328_v33 = vld [vmem:[%s1151_s2 + $0x78] sm:$0xff]  ;;  %v359_v34 = vld [vmem:[%s1151_s2 + $0x170] sm:$0xff]  ;;  %v325_v36 = vld [vmem:[%s1151_s2 + $0x60] sm:$0xff] }
  0x18   : > { %402 = vmatpush.msra.mxu1 %v365_v22  ;;  %442 = vmatpush.msra.mxu3 %v366_v23  ;;  %v360_v35 = vld [vmem:[%s1151_s2 + $0x178] sm:$0xff]  ;;  %v326_v37 = vld [vmem:[%s1151_s2 + $0x68] sm:$0xff]  ;;  %v357_v38 = vld [vmem:[%s1151_s2 + $0x160] sm:$0xff] }
  0x19   : > { %383 = vmatpush.msra.mxu0 %v331_v24  ;;  %423 = vmatpush.msra.mxu2 %v332_v25  ;;  %v358_v39 = vld [vmem:[%s1151_s2 + $0x168] sm:$0xff]  ;;  %v323_v40 = vld [vmem:[%s1151_s2 + $0x50] sm:$0xff]  ;;  %v324_v41 = vld [vmem:[%s1151_s2 + $0x58] sm:$0xff] }
  0x1a   : > { %403 = vmatpush.msra.mxu1 %v363_v26  ;;  %443 = vmatpush.msra.mxu3 %v364_v27  ;;  %v355_v42 = vld [vmem:[%s1151_s2 + $0x150] sm:$0xff]  ;;  %v356_v43 = vld [vmem:[%s1151_s2 + $0x158] sm:$0xff]  ;;  %v321_v44 = vld [vmem:[%s1151_s2 + $0x40] sm:$0xff] }
  0x1b   : > { %384 = vmatpush.msra.mxu0 %v329_v28  ;;  %424 = vmatpush.msra.mxu2 %v330_v29  ;;  %v322_v45 = vld [vmem:[%s1151_s2 + $0x48] sm:$0xff]  ;;  %v353_v46 = vld [vmem:[%s1151_s2 + $0x140] sm:$0xff]  ;;  %v319_v48 = vld [vmem:[%s1151_s2 + $0x30] sm:$0xff]  ;;  %v685_v28 = vmov 4.0  }
  0x1c   : > { %404 = vmatpush.msra.mxu1 %v361_v30  ;;  %444 = vmatpush.msra.mxu3 %v362_v31  ;;  %v354_v47 = vld [vmem:[%s1151_s2 + $0x148] sm:$0xff]  ;;  %v320_v49 = vld [vmem:[%s1151_s2 + $0x38] sm:$0xff]  ;;  %v351_v50 = vld [vmem:[%s1151_s2 + $0x130] sm:$0xff]  ;;  %667 = vrcp.f32 %v685_v28 }
  0x1d   : > { %385 = vmatpush.msra.mxu0 %v327_v32  ;;  %425 = vmatpush.msra.mxu2 %v328_v33  ;;  %v352_v51 = vld [vmem:[%s1151_s2 + $0x138] sm:$0xff]  ;;  %v317_v52 = vld [vmem:[%s1151_s2 + $0x20] sm:$0xff]  ;;  %v318_v53 = vld [vmem:[%s1151_s2 + $0x28] sm:$0xff] }
  0x1e   : > { %405 = vmatpush.msra.mxu1 %v359_v34  ;;  %445 = vmatpush.msra.mxu3 %v360_v35  ;;  %v349_v54 = vld [vmem:[%s1151_s2 + $0x120] sm:$0xff]  ;;  %v350_v55 = vld [vmem:[%s1151_s2 + $0x128] sm:$0xff]  ;;  %v315_v56 = vld [vmem:[%s1151_s2 + $0x10] sm:$0xff] }
  0x1f   : > { %386 = vmatpush.msra.mxu0 %v325_v36  ;;  %426 = vmatpush.msra.mxu2 %v326_v37  ;;  %v316_v57 = vld [vmem:[%s1151_s2 + $0x18] sm:$0xff]  ;;  %v347_v58 = vld [vmem:[%s1151_s2 + $0x110] sm:$0xff]  ;;  %v313_v60 = vld [vmem:[%s1151_s2] sm:$0xff] }
  0x20   : > { %406 = vmatpush.msra.mxu1 %v357_v38  ;;  %446 = vmatpush.msra.mxu3 %v358_v39  ;;  %v348_v59 = vld [vmem:[%s1151_s2 + $0x118] sm:$0xff]  ;;  %v314_v61 = vld [vmem:[%s1151_s2 + $0x8] sm:$0xff]  ;;  %v279_v62 = vld [vmem:[%s1150_s1 + $0xf0] sm:$0xff] }
  0x21   : > { %387 = vmatpush.msra.mxu0 %v323_v40  ;;  %427 = vmatpush.msra.mxu2 %v324_v41  ;;  %v280_v63 = vld [vmem:[%s1150_s1 + $0xf8] sm:$0xff]  ;;  %v345_v0 = vld [vmem:[%s1151_s2 + $0x100] sm:$0xff]  ;;  %v346_v1 = vld [vmem:[%s1151_s2 + $0x108] sm:$0xff] }
  0x22   : > { %407 = vmatpush.msra.mxu1 %v355_v42  ;;  %447 = vmatpush.msra.mxu3 %v356_v43  ;;  %v277_v2 = vld [vmem:[%s1150_s1 + $0xe0] sm:$0xff]  ;;  %v311_v3 = vld [vmem:[%s1150_s1 + $0x1f0] sm:$0xff]  ;;  %v278_v4 = vld [vmem:[%s1150_s1 + $0xe8] sm:$0xff] }
  0x23   : > { %388 = vmatpush.msra.mxu0 %v321_v44  ;;  %428 = vmatpush.msra.mxu2 %v322_v45  ;;  %v312_v5 = vld [vmem:[%s1150_s1 + $0x1f8] sm:$0xff]  ;;  %v275_v6 = vld [vmem:[%s1150_s1 + $0xd0] sm:$0xff]  ;;  %v309_v7 = vld [vmem:[%s1150_s1 + $0x1e0] sm:$0xff]  ;;  %v1046_v44 = vpop.eup %667 }
  0x24   : > { %408 = vmatpush.msra.mxu1 %v353_v46  ;;  %448 = vmatpush.msra.mxu3 %v354_v47  ;;  %v276_v8 = vld [vmem:[%s1150_s1 + $0xd8] sm:$0xff]  ;;  %v310_v9 = vld [vmem:[%s1150_s1 + $0x1e8] sm:$0xff]  ;;  %v273_v10 = vld [vmem:[%s1150_s1 + $0xc0] sm:$0xff]  ;;  %vm226_vm1 = vweird.f32 %v1046_v44 }
  0x25   : > { %389 = vmatpush.msra.mxu0 %v319_v48  ;;  %429 = vmatpush.msra.mxu2 %v320_v49  ;;  %v307_v11 = vld [vmem:[%s1150_s1 + $0x1d0] sm:$0xff]  ;;  %v274_v12 = vld [vmem:[%s1150_s1 + $0xc8] sm:$0xff]  ;;  %v308_v13 = vld [vmem:[%s1150_s1 + $0x1d8] sm:$0xff] }
  0x26   : > { %409 = vmatpush.msra.mxu1 %v351_v50  ;;  %449 = vmatpush.msra.mxu3 %v352_v51  ;;  %v974_v14 = vld [vmem:[%s193_s15] sm:$0xff]  ;;  %v271_v15 = vld [vmem:[%s1150_s1 + $0xb0] sm:$0xff]  ;;  %v272_v17 = vld [vmem:[%s1150_s1 + $0xb8] sm:$0xff] }
  0x27   : > { %390 = vmatpush.msra.mxu0 %v317_v52  ;;  %430 = vmatpush.msra.mxu2 %v318_v53  ;;  %v305_v16 = vld [vmem:[%s1150_s1 + $0x1c0] sm:$0xff]  ;;  %201 = vst [vmem:[#allocation1] ss:$2 sm:$0xff] %v974_v14  ;;  %v306_v18 = vld [vmem:[%s1150_s1 + $0x1c8] sm:$0xff]  ;;  %v303_v20 = vld [vmem:[%s1150_s1 + $0x1b0] sm:$0xff] }
  0x28   : > { %410 = vmatpush.msra.mxu1 %v349_v54  ;;  %450 = vmatpush.msra.mxu3 %v350_v55  ;;  %v269_v19 = vld [vmem:[%s1150_s1 + $0xa0] sm:$0xff]  ;;  %v270_v21 = vld [vmem:[%s1150_s1 + $0xa8] sm:$0xff]  ;;  %v304_v22 = vld [vmem:[%s1150_s1 + $0x1b8] sm:$0xff] }
  0x29   : > { %391 = vmatpush.msra.mxu0 %v315_v56  ;;  %431 = vmatpush.msra.mxu2 %v316_v57  ;;  %v267_v23 = vld [vmem:[%s1150_s1 + $0x90] sm:$0xff]  ;;  %v301_v24 = vld [vmem:[%s1150_s1 + $0x1a0] sm:$0xff]  ;;  %v268_v25 = vld [vmem:[%s1150_s1 + $0x98] sm:$0xff]  ;;  %v222_v56 = vmul.f32 4.0, %v1046_v44 }
  0x2a   : > { %411 = vmatpush.msra.mxu1 %v347_v58  ;;  %451 = vmatpush.msra.mxu3 %v348_v59  ;;  %v302_v26 = vld [vmem:[%s1150_s1 + $0x1a8] sm:$0xff]  ;;  %v265_v27 = vld [vmem:[%s1150_s1 + $0x80] sm:$0xff]  ;;  %v299_v29 = vld [vmem:[%s1150_s1 + $0x190] sm:$0xff] }
  0x2b   : > { %392 = vmatpush.msra.mxu0 %v313_v60  ;;  %432 = vmatpush.msra.mxu2 %v314_v61  ;;  %v266_v30 = vld [vmem:[%s1150_s1 + $0x88] sm:$0xff]  ;;  %v300_v31 = vld [vmem:[%s1150_s1 + $0x198] sm:$0xff]  ;;  %v263_v34 = vld [vmem:[%s1150_s1 + $0x70] sm:$0xff] }
  0x2c   : > { %412 = vmatpush.msra.mxu1 %v345_v0  ;;  %452 = vmatpush.msra.mxu3 %v346_v1  ;;  %v297_v35 = vld [vmem:[%s1150_s1 + $0x180] sm:$0xff]  ;;  %v264_v38 = vld [vmem:[%s1150_s1 + $0x78] sm:$0xff]  ;;  %v298_v39 = vld [vmem:[%s1150_s1 + $0x188] sm:$0xff] }
  0x2d   : > { %457 = vmatpush.msrb.mxu0 %v279_v62  ;;  %497 = vmatpush.msrb.mxu2 %v280_v63  ;;  %v261_v41 = vld [vmem:[%s1150_s1 + $0x60] sm:$0xff]  ;;  %v295_v42 = vld [vmem:[%s1150_s1 + $0x170] sm:$0xff]  ;;  %v262_v45 = vld [vmem:[%s1150_s1 + $0x68] sm:$0xff] }
  0x2e   : > { %477 = vmatpush.msrb.mxu1 %v311_v3  ;;  %517 = vmatpush.msrb.mxu3 %v312_v5  ;;  %v202_v32 = vld.sshfl [vmem:[#allocation1] sm:$0xff pattern:$0x75316420]  ;;  %v203_v33 = vld.sshfl [vmem:[#allocation1 + $0x8] sm:$0xff pattern:$0x75316420] }
  0x2f   : > { %458 = vmatpush.msrb.mxu0 %v277_v2  ;;  %498 = vmatpush.msrb.mxu2 %v278_v4  ;;  %230 = vst [vmem:[#allocation1] ss:$2 sm:$0xff] %v974_v14  ;;  %v207_v36 = vsel %vm206_vm0, %v202_v32, 0.0  ;;  %v214_v37 = vsel %vm206_vm0, %v203_v33, 0.0  ;;  %v296_v46 = vld [vmem:[%s1150_s1 + $0x178] sm:$0xff]  ;;  %v259_v47 = vld [vmem:[%s1150_s1 + $0x50] sm:$0xff] }
  0x30   : > { %478 = vmatpush.msrb.mxu1 %v309_v7  ;;  %518 = vmatpush.msrb.mxu3 %v310_v9  ;;  %v208_v40 = vrot.slane %v207_v36, 4  ;;  %v215_v43 = vrot.slane %v214_v37, 4  ;;  %v293_v48 = vld [vmem:[%s1150_s1 + $0x160] sm:$0xff]  ;;  %v260_v49 = vld [vmem:[%s1150_s1 + $0x58] sm:$0xff]  ;;  %v294_v50 = vld [vmem:[%s1150_s1 + $0x168] sm:$0xff]  ;;  %v223_v7 = vsub.f32 1.0, %v222_v56 }
  0x31   : > { %459 = vmatpush.msrb.mxu0 %v275_v6  ;;  %499 = vmatpush.msrb.mxu2 %v276_v8  ;;  %v257_v51 = vld [vmem:[%s1150_s1 + $0x40] sm:$0xff]  ;;  %v291_v53 = vld [vmem:[%s1150_s1 + $0x150] sm:$0xff]  ;;  %v258_v54 = vld [vmem:[%s1150_s1 + $0x48] sm:$0xff] }
  0x32   : > { %479 = vmatpush.msrb.mxu1 %v307_v11  ;;  %519 = vmatpush.msrb.mxu3 %v308_v13  ;;  %v209_v52 = vadd.f32 %v208_v40, %v207_v36  ;;  %v292_v55 = vld [vmem:[%s1150_s1 + $0x158] sm:$0xff]  ;;  %v216_v57 = vadd.f32 %v215_v43, %v214_v37  ;;  %v255_v62 = vld [vmem:[%s1150_s1 + $0x30] sm:$0xff]  ;;  %v289_v63 = vld [vmem:[%s1150_s1 + $0x140] sm:$0xff] }
  0x33   : > { %460 = vmatpush.msrb.mxu0 %v273_v10  ;;  %500 = vmatpush.msrb.mxu2 %v274_v12  ;;  %v256_v2 = vld [vmem:[%s1150_s1 + $0x38] sm:$0xff]  ;;  %v290_v3 = vld [vmem:[%s1150_s1 + $0x148] sm:$0xff]  ;;  %v253_v5 = vld [vmem:[%s1150_s1 + $0x20] sm:$0xff] }
  0x34   : > { %480 = vmatpush.msrb.mxu1 %v305_v16  ;;  %520 = vmatpush.msrb.mxu3 %v306_v18  ;;  %v210_v4 = vrot.slane %v209_v52, 2  ;;  %v287_v6 = vld [vmem:[%s1150_s1 + $0x130] sm:$0xff]  ;;  %v217_v8 = vrot.slane %v216_v57, 2  ;;  %v254_v11 = vld [vmem:[%s1150_s1 + $0x28] sm:$0xff]  ;;  %v288_v12 = vld [vmem:[%s1150_s1 + $0x138] sm:$0xff] }
  0x35   : > { %461 = vmatpush.msrb.mxu0 %v271_v15  ;;  %501 = vmatpush.msrb.mxu2 %v272_v17  ;;  %v251_v13 = vld [vmem:[%s1150_s1 + $0x10] sm:$0xff]  ;;  %v285_v15 = vld [vmem:[%s1150_s1 + $0x120] sm:$0xff]  ;;  %v252_v18 = vld [vmem:[%s1150_s1 + $0x18] sm:$0xff] }
  0x36   : > { %481 = vmatpush.msrb.mxu1 %v303_v20  ;;  %521 = vmatpush.msrb.mxu3 %v304_v22  ;;  %v231_v58 = vld.sshfl [vmem:[#allocation1] sm:$0xff pattern:$0x75316420]  ;;  %v232_v59 = vld.sshfl [vmem:[#allocation1 + $0x8] sm:$0xff pattern:$0x75316420]  ;;  %v211_v20 = vadd.f32 %v210_v4, %v209_v52  ;;  %v538_v52 = vstv %s537_s8 }
  0x37   : > { %462 = vmatpush.msrb.mxu0 %v269_v19  ;;  %502 = vmatpush.msrb.mxu2 %v270_v21  ;;  %v235_v60 = vsel %vm206_vm0, %v231_v58, -inf  ;;  %v242_v61 = vsel %vm206_vm0, %v232_v59, -inf  ;;  %v286_v19 = vld [vmem:[%s1150_s1 + $0x128] sm:$0xff]  ;;  %v249_v21 = vld [vmem:[%s1150_s1] sm:$0xff]  ;;  %v283_v22 = vld [vmem:[%s1150_s1 + $0x110] sm:$0xff] }
  0x38   : > { %482 = vmatpush.msrb.mxu1 %v301_v24  ;;  %522 = vmatpush.msrb.mxu3 %v302_v26  ;;  %v236_v0 = vrot.slane %v235_v60, 4  ;;  %v243_v1 = vrot.slane %v242_v61, 4  ;;  %v218_v24 = vadd.f32 %v217_v8, %v216_v57  ;;  %v284_v28 = vld [vmem:[%s1150_s1 + $0x118] sm:$0xff]  ;;  %v212_v32 = vrot.slane %v211_v20, 1  ;;  %v282_v33 = vld [vmem:[%s1150_s1 + $0x108] sm:$0xff] }
  0x39   : > { %463 = vmatpush.msrb.mxu0 %v267_v23  ;;  %503 = vmatpush.msrb.mxu2 %v268_v25  ;;  %v224_v23 = vmul.f32 %v1046_v44, %v223_v7 }
  0x3a   : > { %483 = vmatpush.msrb.mxu1 %v299_v29  ;;  %523 = vmatpush.msrb.mxu3 %v300_v31  ;;  %v237_v9 = vmax.f32 %v235_v60, %v236_v0  ;;  %v244_v10 = vmax.f32 %v242_v61, %v243_v1  ;;  %v281_v29 = vld [vmem:[%s1150_s1 + $0x100] sm:$0xff] }
  0x3b   : > { %464 = vmatpush.msrb.mxu0 %v265_v27  ;;  %504 = vmatpush.msrb.mxu2 %v266_v30  ;;  %v250_v27 = vld [vmem:[%s1150_s1 + $0x8] sm:$0xff] }
  0x3c   : > { %484 = vmatpush.msrb.mxu1 %v297_v35  ;;  %524 = vmatpush.msrb.mxu3 %v298_v39  ;;  %v238_v16 = vrot.slane %v237_v9, 2  ;;  %v245_v17 = vrot.slane %v244_v10, 2  ;;  %v219_v35 = vrot.slane %v218_v24, 1 }
  0x3d   : > { %465 = vmatpush.msrb.mxu0 %v263_v34  ;;  %505 = vmatpush.msrb.mxu2 %v264_v38  ;;  %v225_v34 = vadd.f32 %v1046_v44, %v224_v23  ;;  %v213_v38 = vadd.f32 %v212_v32, %v211_v20 }
  0x3e   : > { %485 = vmatpush.msrb.mxu1 %v295_v42  ;;  %525 = vmatpush.msrb.mxu3 %v296_v46  ;;  %v239_v25 = vmax.f32 %v237_v9, %v238_v16  ;;  %v246_v26 = vmax.f32 %v244_v10, %v245_v17  ;;  %v220_v40 = vadd.f32 %v219_v35, %v218_v24 }
  0x3f   : > { %466 = vmatpush.msrb.mxu0 %v261_v41  ;;  %506 = vmatpush.msrb.mxu2 %v262_v45  ;;  %v227_v39 = vsel %vm226_vm1, %v1046_v44, %v225_v34 }
  0x40   : > { %486 = vmatpush.msrb.mxu1 %v293_v48  ;;  %526 = vmatpush.msrb.mxu3 %v294_v50  ;;  %v240_v30 = vrot.slane %v239_v25, 1  ;;  %v247_v31 = vrot.slane %v246_v26, 1  ;;  %v228_v41 = vmul.f32 %v227_v39, %v213_v38  ;;  %v229_v42 = vmul.f32 %v227_v39, %v220_v40 }
  0x41   : > { %467 = vmatpush.msrb.mxu0 %v259_v47  ;;  %507 = vmatpush.msrb.mxu2 %v260_v49 }
  0x42   : > { %487 = vmatpush.msrb.mxu1 %v291_v53  ;;  %527 = vmatpush.msrb.mxu3 %v292_v55  ;;  %v241_v36 = vmax.f32 %v239_v25, %v240_v30  ;;  %v248_v37 = vmax.f32 %v246_v26, %v247_v31 }
  0x43   : > { %468 = vmatpush.msrb.mxu0 %v257_v51  ;;  %508 = vmatpush.msrb.mxu2 %v258_v54 }
  0x44   : > { %488 = vmatpush.msrb.mxu1 %v289_v63  ;;  %528 = vmatpush.msrb.mxu3 %v290_v3 }
  0x45   : > { %469 = vmatpush.msrb.mxu0 %v255_v62  ;;  %509 = vmatpush.msrb.mxu2 %v256_v2 }
  0x46   : > { %489 = vmatpush.msrb.mxu1 %v287_v6  ;;  %529 = vmatpush.msrb.mxu3 %v288_v12 }
  0x47   : > { %470 = vmatpush.msrb.mxu0 %v253_v5  ;;  %510 = vmatpush.msrb.mxu2 %v254_v11 }
  0x48   : > { %490 = vmatpush.msrb.mxu1 %v285_v15  ;;  %530 = vmatpush.msrb.mxu3 %v286_v19 }
  0x49   : > { %471 = vmatpush.msrb.mxu0 %v251_v13  ;;  %511 = vmatpush.msrb.mxu2 %v252_v18 }
  0x4a   : > { %491 = vmatpush.msrb.mxu1 %v283_v22  ;;  %531 = vmatpush.msrb.mxu3 %v284_v28 }
  0x4b   : > { %472 = vmatpush.msrb.mxu0 %v249_v21  ;;  %512 = vmatpush.msrb.mxu2 %v250_v27 }
  0x4c   : > { %492 = vmatpush.msrb.mxu1 %v281_v29  ;;  %532 = vmatpush.msrb.mxu3 %v282_v33 }
  0x4d   : > { %393 = vmatmul.f32.vlgmr.msra.gmra.mxu0 %v241_v36  ;;  %433 = vmatmul.f32.vlgmr.msra.gmra.mxu2 %v241_v36 }
  0x4e   : > { %453 = vmatmul.f32.vlgmr.msra.gmra.mxu3 %v248_v37  ;;  %413 = vmatmul.f32.vlgmr.msra.gmra.mxu1 %v248_v37 }
  0x55   : > { %473 = vmatmul.f32.vlgmr.msrb.gmra.mxu0 %v228_v41  ;;  %513 = vmatmul.f32.vlgmr.msrb.gmra.mxu2 %v228_v41 }
  0x56   : > { %493 = vmatmul.f32.vlgmr.msrb.gmra.mxu1 %v229_v42  ;;  %533 = vmatmul.f32.vlgmr.msrb.gmra.mxu3 %v229_v42 }
  0xca   : > { %v394_v43 = vpop.f32.mrf.mxu0 }
  0xcb   : > { %v414_v45 = vpop.f32.mrf.mxu1 }
  0xcc   : > { %v415_v46 = vadd.f32 %v414_v45, %v394_v43 }
  0xd0   : > { %v434_v47 = vpop.f32.mrf.mxu2 }
  0xd1   : > { %v454_v48 = vpop.f32.mrf.mxu3 }
  0xd2   : > { %v474_v49 = vpop.f32.mrf.mxu0  ;;  %v455_v54 = vadd.f32 %v454_v48, %v434_v47 }
  0xd3   : > { %v475_v50 = vadd.f32 %v474_v49, %v415_v46  ;;  %v494_v51 = vpop.f32.mrf.mxu1 }
  0xd5   : > { %v495_v53 = vadd.f32 %v494_v51, %v475_v50 }
  0xd7   : > { %v539_v44 = vadd.f32 %v538_v52, %v495_v53 }
  0xd8   : > { %v514_v55 = vpop.f32.mrf.mxu2 }
  0xd9   : > { %v652_v56 = vmul.f32 -1.442695, %v539_v44  ;;  %v515_v57 = vadd.f32 %v514_v55, %v455_v54  ;;  %v534_v58 = vpop.f32.mrf.mxu3 }
  0xdb   : > { %669 = vpow2.f32 %v652_v56  ;;  %v535_v59 = vadd.f32 %v534_v58, %v515_v57 }
  0xdd   : > { %v540_v60 = vadd.f32 %v538_v52, %v535_v59 }
  0xdf   : > { %v653_v61 = vmul.f32 -1.442695, %v540_v60 }
  0xe1   : > { %v670_v62 = vpop.eup %669  ;;  %671 = vpow2.f32 %v653_v61 }
  0xe2   : > { %v547_v63 = vadd.f32 1.0, %v670_v62 }
  0xe4   : > { %673 = vrcp.f32 %v547_v63  ;;  %vm554_vm3 = vweird.f32 %v547_v63  ;;  %v560_v10 = vand.u32 2147483648, %v547_v63  ;;  %v558_v12 = vand.u32 2147483647, %v547_v63 }
  0xe6   : > { %v561_v18 = vor.u32 1.1754944e-38, %v560_v10  ;;  %vm559_vm8 = vcmp.eq.f32.partialorder %v558_v12, 8.507059e+37 }
  0xe7   : > { %v672_v0 = vpop.eup %671 }
  0xe8   : > { %v548_v1 = vadd.f32 1.0, %v672_v0 }
  0xea   : > { %v674_v2 = vpop.eup %673  ;;  %675 = vrcp.f32 %v548_v1  ;;  %v575_v11 = vand.u32 2147483648, %v548_v1  ;;  %v573_v15 = vand.u32 2147483647, %v548_v1  ;;  %vm569_vm6 = vweird.f32 %v548_v1 }
  0xeb   : > { %v550_v3 = vmul.f32 %v674_v2, %v547_v63  ;;  %vm555_vm2 = vweird.f32 %v674_v2 }
  0xec   : > { %vm556_vm5 = vmor %vm554_vm3, %vm555_vm2  ;;  %v576_v19 = vor.u32 1.1754944e-38, %v575_v11  ;;  %vm574_vm9 = vcmp.eq.f32.partialorder %v573_v15, 8.507059e+37 }
  0xed   : > { %v551_v4 = vsub.f32 1.0, %v550_v3 }
  0xef   : > { %v552_v5 = vmul.f32 %v674_v2, %v551_v4 }
  0xf0   : > { %v676_v6 = vpop.eup %675 }
  0xf1   : > { %v565_v7 = vmul.f32 %v676_v6, %v548_v1  ;;  %v553_v8 = vadd.f32 %v674_v2, %v552_v5  ;;  %vm570_vm4 = vweird.f32 %v676_v6 }
  0xf2   : > { %vm571_vm7 = vmor %vm569_vm6, %vm570_vm4 }
  0xf3   : > { %v566_v9 = vsub.f32 1.0, %v565_v7  ;;  %v557_v16 = vsel %vm556_vm5, %v674_v2, %v553_v8 }
  0xf4   : > { %v562_v21 = vsel %vm559_vm8, %v561_v18, %v557_v16 }
  0xf5   : > { %v567_v13 = vmul.f32 %v676_v6, %v566_v9  ;;  %v579_v24 = vperm.slane %v562_v21, 0 }
  0xf7   : > { %v568_v17 = vadd.f32 %v676_v6, %v567_v13 }
  0xf9   : > { %v572_v20 = vsel %vm571_vm7, %v676_v6, %v568_v17 }
  0xfa   : > { %v577_v22 = vsel %vm574_vm9, %v576_v19, %v572_v20 }
  0xfb   : > { %v580_v23 = vperm.slane %v577_v22, 0 }
  0xfd   : > { %v583_v25 = vrot.slane %v580_v23, 4 }
  0xff   : > { %v584_v26 = vsel %vm206_vm0, %v579_v24, %v583_v25 }
 0x100   : > { %v586_v27 = vmul.f32 %v584_v26, %v974_v14 }
 0x102   : > { %587 = vst [vmem:[%s198_s11] sm:$0xff] %v586_v27 }
 0x103 PF: > { %s15_s17 = sadd.s32 1, %s683_s17  }
 0x104   : > { %p12_p4 = scmp.ge.s32.totalorder %s15_s17, 4  }
 0x106   :  { %14 = sbr.rel (!%p12_p4) target bundleno = 2 (0x2), region = 66 }

</bundles_post_ra>
